<compile_context>
chip_gen: v6e
topology: v6e:2x2x1
jax: 0.10.0
libtpu: 0.0.40
codegen_flags: <defaults>
</compile_context>

<pallas_src>
import jax
import jax.numpy as jnp
from jax.experimental import pallas as pl
from jax.experimental.pallas import tpu as pltpu


def _neighbor_diff_kernel(x_ref, o_ref):
    """out[:, j] = x[:, j] - x[:, j+1]; output width is C-1."""
    x = x_ref[...]
    o_ref[...] = x[:, :-1] - x[:, 1:]


def _row_tile(n, c, dtype, *, target_tile_bytes=2 << 20, min_grid=8):
    """Byte-budgeted, dtype-aware row tile that still yields several grid steps."""
    itemsize = jnp.dtype(dtype).itemsize
    sub = max(8, 32 // itemsize)        # sublane packing: 8 f32, 16 bf16, 32 int8/fp8
    if n <= sub:
        return n                        # full-extent block (always legal)
    bytes_per_row = max(1, c * itemsize)
    # Tile sized by bytes (amortizes ~0.35us/step grid overhead, fits VMEM).
    tn_bytes = max(sub, (target_tile_bytes // bytes_per_row) // sub * sub)
    # But keep at least ~min_grid grid steps so v7x's 2 TCs both get work.
    tn_even = max(sub, ((pl.cdiv(n, min_grid) + sub - 1) // sub) * sub)
    tn = min(tn_bytes, tn_even)
    # Never exceed the (sublane-rounded) row count.
    tn = min(tn, ((n + sub - 1) // sub) * sub)
    return max(sub, tn)


def neighbor_differentiator(x, *, target_tile_bytes=2 << 20, min_pallas_bytes=1 << 20):
    """Pallas equivalent of _NeighborDifferentiator.forward.

    x: (N, C) array with C > 1. Returns (N, C-1), out[:, j] = x[:, j] - x[:, j+1].
    """
    assert x.ndim == 2, x.ndim
    n, c = x.shape
    assert c > 1, c

    itemsize = jnp.dtype(x.dtype).itemsize
    # Small-total-bytes bailout: let XLA fuse the slice-subtract (module-typical
    # shapes such as (8, 16) land here).
    if n * c * itemsize < min_pallas_bytes:
        return x[:, :-1] - x[:, 1:]

    tn = _row_tile(n, c, x.dtype, target_tile_bytes=target_tile_bytes)
    grid = (pl.cdiv(n, tn),)

    return pl.pallas_call(
        _neighbor_diff_kernel,
        out_shape=jax.ShapeDtypeStruct((n, c - 1), x.dtype),
        grid=grid,
        in_specs=[pl.BlockSpec((tn, c), lambda i: (i, 0))],
        out_specs=pl.BlockSpec((tn, c - 1), lambda i: (i, 0)),
        compiler_params=pltpu.CompilerParams(
            dimension_semantics=("parallel",)),
    )(x)


def _reference(x):
    # Pure-JAX reference (same math as F.conv1d with kernel [+1, -1]).
    return x[:, :-1] - x[:, 1:]


if __name__ == "__main__":
    key = jax.random.PRNGKey(0)
    k1, k2, k3 = jax.random.split(key, 3)

    # 1) Module-typical tiny shape (nbr_samples=8, nbr_classes=16):
    #    hits the fused-XLA bailout path.
    x_small = jax.random.normal(k1, (8, 16), dtype=jnp.float32)
    out_small = jax.block_until_ready(neighbor_differentiator(x_small))
    assert out_small.shape == (8, 15), out_small.shape
    assert jnp.allclose(out_small, _reference(x_small), atol=1e-6, rtol=1e-6), \
        "mismatch (bailout path)"

    # 2) Lane-aligned width, large enough for the Pallas path; N chosen so the
    #    last row block is partial (exercises masked writeback).
    x_aligned = jax.random.normal(k2, (2000, 256), dtype=jnp.float32)
    out_aligned = jax.block_until_ready(neighbor_differentiator(x_aligned))
    assert out_aligned.shape == (2000, 255), out_aligned.shape
    assert jnp.allclose(out_aligned, _reference(x_aligned), atol=1e-6, rtol=1e-6), \
        "mismatch (aligned Pallas path)"

    # 3) Non-lane-aligned width, still large enough for the Pallas path.
    x_unaligned = jax.random.normal(k3, (4096, 96), dtype=jnp.float32)
    out_unaligned = jax.block_until_ready(neighbor_differentiator(x_unaligned))
    assert out_unaligned.shape == (4096, 95), out_unaligned.shape
    assert jnp.allclose(out_unaligned, _reference(x_unaligned), atol=1e-6, rtol=1e-6), \
        "mismatch (unaligned Pallas path)"

    print("KERNEL_OK")
</pallas_src>

<mosaic_0001>
module attributes {stable_mosaic.version = 11 : i64} {
  func.func @_neighbor_diff_kernel(%arg0: i32, %arg1: memref<256x256xf32, #tpu.memory_space<vmem>>, %arg2: memref<256x255xf32, #tpu.memory_space<vmem>>) attributes {dimension_semantics = [#tpu.dimension_semantics<parallel>], iteration_bounds = array<i64: 8>, scalar_prefetch = 0 : i64, scratch_operands = 0 : i64, tpu.core_type = #tpu.core_type<tc>, window_params = [{transform_indices = @transform_0, window_bounds = array<i64: 256, 256>}, {transform_indices = @transform_1, window_bounds = array<i64: 256, 255>}]} {
    %c0 = arith.constant 0 : index
    %c0_0 = arith.constant 0 : index
    %0 = vector.load %arg1[%c0, %c0_0] : memref<256x256xf32, #tpu.memory_space<vmem>>, vector<256x256xf32>
    %1 = vector.extract_strided_slice %0 {offsets = [0, 0], sizes = [256, 255], strides = [1, 1]} : vector<256x256xf32> to vector<256x255xf32>
    %2 = vector.extract_strided_slice %0 {offsets = [0, 1], sizes = [256, 255], strides = [1, 1]} : vector<256x256xf32> to vector<256x255xf32>
    %3 = arith.subf %1, %2 : vector<256x255xf32>
    %c0_1 = arith.constant 0 : index
    %c0_2 = arith.constant 0 : index
    %4 = vector.load %arg2[%c0_1, %c0_2] : memref<256x255xf32, #tpu.memory_space<vmem>>, vector<256x255xf32>
    tpu.vector_store %arg2[%c0_1, %c0_2], %3 {strides = array<i32>} : memref<256x255xf32, #tpu.memory_space<vmem>>, vector<256x255xf32>,
    return
  }
  func.func @transform_0(%arg0: i32) -> (i32, i32) {
    %c0_i32 = arith.constant 0 : i32
    %c0_i32_0 = arith.constant 0 : i32
    return %arg0, %c0_i32 : i32, i32
  }
  func.func @transform_1(%arg0: i32) -> (i32, i32) {
    %c0_i32 = arith.constant 0 : i32
    %c0_i32_0 = arith.constant 0 : i32
    return %arg0, %c0_i32 : i32, i32
  }
}

</mosaic_0001>

<bundles_post_ra>
// kernel: tpu_custom_call.1
= control target key start
LH: loop header
LB: loop body
LE: loop exit
PB: predicated region body
PF: predicated region fallthrough
CT: control target
= control target key end

     0   :  { %6 = vsyncpa [#allocation3], 0  ;;  %s1602_s0 = inlined_call_operand.hbm [shape: f32[2000,256], index: 0, kind: input, shape index: {}]   ;;  %s1603_s1 = inlined_call_operand.hbm [shape: f32[2000,255], index: 1, kind: output, shape index: {}]  }
   0x1   :  { %8 = vsyncpa [#allocation3 + $0x1], 0 }
   0x2   :  { %9 = vsyncpa [#allocation4], 0 }
   0x3   :  { %11 = vsyncpa [#allocation4 + $0x1], 0  ;;  %s916_s6 = smov 0   ;;  %s918_s7 = smov 0  }
   0x4   :  { %s920_s8 = smov 0   ;;  %s922_s9 = smov 0  }
   0x5 LB: > { %s937_s10 = sadd.s32 4294967295, %s897_s9   ;;  %s731_s11 = sadd.s32 4294967294, %s897_s9   ;;  %s897_s9 = sphi %s922_s9, %s1635_s9   ;;  %s893_s8 = sphi %s920_s8, %s1634_s8   ;;  %s889_s7 = sphi %s918_s7, %s1633_s7   ;;  %s885_s6 = sphi %s916_s6, %s1632_s6  }
   0x6   : > { %s941_s12 = sadd.s32 1, %s897_s9   ;;  %s24_s13 = sadd.s32 1, %s893_s8 }
   0x7   : > { %s21_s14 = ssub.s32 %s897_s9, %s941_s12  ;;  %p31_p0 = scmp.ne.s32.totalorder %s893_s8, %s889_s7 }
   0x8   : > { %p22_p1 = scmp.eq.s32.totalorder %s21_s14, 0  ;;  %p32_p2 = scmp.eq.s32.totalorder %s897_s9, 0 }
   0x9   : > { %p37_p3 = scmp.ne.s32.totalorder %s889_s7, %s885_s6  ;;  %p38_p4 = scmp.eq.s32.totalorder %s937_s10, 0 }
   0xa   : > { %s953_s15 = scalar_select %p22_p1, %s893_s8, %s24_s13  }
   0xb   : > { %p33_p5 = por %p32_p2, %p31_p0  ;;  %p955_p6 = por %p38_p4, %p37_p3 }
   0xc   : > { %p61_p7 = scmp.eq.s32.totalorder %s937_s10, 7  ;;  %p67_p8 = scmp.eq.s32.totalorder %s731_s11, 7 }
   0xd   : > { %p733_p11 = scmp.ge.s32.totalorder %s897_s9, 8 }
   0xe   : > { %p960_p9 = por %p61_p7, %p31_p0  ;;  %p964_p10 = por %p67_p8, %p37_p3 }
   0xf   : > { %83 = sbr.rel (%p733_p11) target bundleno = 52 (0x34), region = 16 }
  0x10   : > { %s1614_s18 = scalar_select %p964_p10, 1, 0 }
  0x14   : > { %86 = sbr.rel (!%p33_p5) target bundleno = 52 (0x34), region = 20  ;;  %s87_s19 = sand.u32 (%p33_p5), 1, %s893_s8  }
  0x15   : > { %s735_s20 = sshll.u32 (%p33_p5), %s897_s9, 5  ;;  %s734_s21 = sshll.u32 (%p33_p5), %s87_s19, 9 }
  0x16   : > { %s93_s22 = ssub.s32 (%p33_p5), 250, %s735_s20  ;;  %s974_s25 = scalar_lea.sflag (%p33_p5), [#allocation3], %s87_s19 }
  0x17   : > { %p94_p12 = scmp.lt.s32.totalorder (%p33_p5), %s93_s22, 32  ;;  %s91_s26 = scalar_lea.vmem (%p33_p5), [#allocation2], %s734_s21 }
  0x19   : > { %s1637_s22 = smov (!%p94_p12, %s93_s22), 32 }
  0x1a   : > { %s971_s23 = sshll.u32 %s1637_s22, 8 }
  0x1b   : > { %s99_s24 = ssub.s32 8192, %s971_s23 }
  0x1c   : > { %100 = vsyncadd %s974_s25, %s99_s24  ;;  %p738_p13 = scmp.ne.s32.totalorder %s971_s23, 0  ;;  %s759_s27 = sshll.u32 %s897_s9, 13 }
  0x1d   : > { %s982_s30 = scalar_lea.hbm %s1602_s0, %s759_s27  ;;  %s106_s2 = sshll.u32 %s91_s26, 4  ;;  %s984_s2 = int_to_ptr.vmem [resolvable:$true] %s106_s2 }
  0x1e   : > { %s807_s3 = scalar_lea.hbm %s982_s30, %s971_s23  ;;  %s811_s11 = scalar_lea.hbm %s1602_s0, 64000 }
  0x1f   : > { %p808_p0 = scmp.ne.s32.totalorder %s982_s30, %s807_s3  ;;  %p812_p3 = scmp.lt.s32.totalorder %s982_s30, %s1602_s0 }
  0x20   : > { %p813_p4 = scmp.lt.s32.totalorder %s811_s11, %s807_s3 }
  0x21   : > { %p809_p1 = pnand %p808_p0, %p738_p13 }
  0x22   : > { %p814_p5 = por %p813_p4, %p812_p3 }
  0x23   : > { %p810_p2 = pneg %p809_p1 }
  0x25   : > { %p815_p7 = pnand %p814_p5, %p810_p2 }
  0x27   : > { %818 = shalt.err (!%p815_p7)
}
  0x28   : > { %s819_s19 = scalar_lea.vmem %s984_s2, %s971_s23  ;;  %s899_s20 = smov [#allocation2]  }
  0x29   : > { %p820_p8 = scmp.ne.s32.totalorder %s984_s2, %s819_s19  ;;  %s823_s21 = sshll.u32 %s899_s20, 4  ;;  %s824_s21 = int_to_ptr.vmem [resolvable:$false] %s823_s21 }
  0x2a   : > { %s825_s22 = scalar_lea.vmem %s824_s21, 16384  ;;  %p826_p0 = scmp.lt.s32.totalorder %s984_s2, %s824_s21 }
  0x2b   : > { %p821_p11 = pnand %p820_p8, %p738_p13  ;;  %p827_p1 = scmp.lt.s32.totalorder %s825_s22, %s819_s19 }
  0x2d   : > { %p822_p12 = pneg %p821_p11  ;;  %p828_p10 = por %p827_p1, %p826_p0 }
  0x2f   : > { %p829_p3 = pnand %p828_p10, %p822_p12 }
  0x31   : > { %832 = shalt.err (!%p829_p3)
}
  0x32   : > { %s900_s24 = smov 256   ;;  %s901_s26 = smov 16  }
  0x33   : > { %112 = dma.hbm_to_vmem [thread:$0]  (%p738_p13), %s982_s30, %s971_s23, %s984_s2, %s974_s25, %s900_s24, %s900_s24, %s901_s26  }
  0x34 PF: > { %p743_p2 = scmp.ge.s32.totalorder %s897_s9, 1  ;;  %p114_p4 = scmp.lt.s32.totalorder %s897_s9, 9 }
  0x36   : > { %p115_p5 = pnand %p743_p2, %p114_p4 }
  0x38   : > { %118 = sbr.rel (%p115_p5) target bundleno = 336 (0x150), region = 24 }
  0x3d   : > { %s1013_s27 = sand.u32 1, %s889_s7  }
  0x3e   : > { %s744_s28 = sshll.u32 %s1013_s27, 9  ;;  %s121_s29 = scalar_lea.sflag [#allocation3], %s1013_s27 }
  0x3f   : > { %s1019_s3 = scalar_lea.vmem [#allocation2], %s744_s28 }
  0x40   : > { %876 = dma.done.wait (%p955_p6), %s121_s29, 8192  }
  0x41   : > { %878 = vsyncadd (%p955_p6), %s121_s29, 4294959104  ;;  %v1026_v0 = vld [vmem:[%s1019_s3 + $0x10] sm:$0xff]  ;;  %v1029_v1 = vld [vmem:[%s1019_s3] sm:$0xff]  ;;  %s902_s23 = smov 127   ;;  %vm411_vm0 = vcmask 1039360   ;;  %s1343_s16 = scalar_lea.vmem [#allocation5], %s744_s28 }
  0x42   : > { %287 = vrot.lane.b32.xlu1 %v1026_v0, %s902_s23  ;;  %283 = vrot.lane.b32.xlu0 %v1029_v1, %s902_s23  ;;  %v1036_v2 = vld [vmem:[%s1019_s3 + $0x18] sm:$0xff]  ;;  %v1039_v3 = vld [vmem:[%s1019_s3 + $0x8] sm:$0xff]  ;;  %s637_s25 = scalar_lea.sflag [#allocation4], %s1013_s27  ;;  %s747_s30 = sshll.u32 (%p960_p9), %s937_s10, 5 }
  0x43   : > { %v1046_v4 = vld [vmem:[%s1019_s3 + $0x28] sm:$0xff]  ;;  %v1049_v5 = vld [vmem:[%s1019_s3 + $0x20] sm:$0xff]  ;;  %v1056_v6 = vld [vmem:[%s1019_s3 + $0x38] sm:$0xff]  ;;  %s645_s2 = ssub.s32 (%p960_p9), 250, %s747_s30 }
  0x44   : > { %v1059_v7 = vld [vmem:[%s1019_s3 + $0x30] sm:$0xff]  ;;  %v1066_v8 = vld [vmem:[%s1019_s3 + $0x48] sm:$0xff]  ;;  %v1069_v9 = vld [vmem:[%s1019_s3 + $0x40] sm:$0xff]  ;;  %p646_p6 = scmp.lt.s32.totalorder (%p960_p9), %s645_s2, 32 }
  0x45   : > { %v1076_v10 = vld [vmem:[%s1019_s3 + $0x58] sm:$0xff]  ;;  %v1079_v11 = vld [vmem:[%s1019_s3 + $0x50] sm:$0xff]  ;;  %v1086_v12 = vld [vmem:[%s1019_s3 + $0x68] sm:$0xff] }
  0x46   : > { %289 = vrot.lane.b32.xlu1 %v1036_v2, %s902_s23  ;;  %285 = vrot.lane.b32.xlu0 %v1039_v3, %s902_s23  ;;  %v1089_v13 = vld [vmem:[%s1019_s3 + $0x60] sm:$0xff]  ;;  %v1096_v14 = vld [vmem:[%s1019_s3 + $0x78] sm:$0xff] }
  0x47   : > { %v1099_v15 = vld [vmem:[%s1019_s3 + $0x70] sm:$0xff]  ;;  %v1106_v16 = vld [vmem:[%s1019_s3 + $0x88] sm:$0xff]  ;;  %v1109_v17 = vld [vmem:[%s1019_s3 + $0x80] sm:$0xff] }
  0x48   : > { %v1116_v18 = vld [vmem:[%s1019_s3 + $0x98] sm:$0xff]  ;;  %v1119_v19 = vld [vmem:[%s1019_s3 + $0x90] sm:$0xff]  ;;  %v1126_v20 = vld [vmem:[%s1019_s3 + $0xa8] sm:$0xff] }
  0x49   : > { %v1129_v21 = vld [vmem:[%s1019_s3 + $0xa0] sm:$0xff]  ;;  %v1136_v22 = vld [vmem:[%s1019_s3 + $0xb8] sm:$0xff]  ;;  %v1139_v23 = vld [vmem:[%s1019_s3 + $0xb0] sm:$0xff] }
  0x4a   : > { %293 = vrot.lane.b32.xlu1 %v1046_v4, %s902_s23  ;;  %291 = vrot.lane.b32.xlu0 %v1049_v5, %s902_s23  ;;  %v1146_v24 = vld [vmem:[%s1019_s3 + $0xc8] sm:$0xff]  ;;  %v1149_v25 = vld [vmem:[%s1019_s3 + $0xc0] sm:$0xff] }
  0x4b   : > { %v1156_v26 = vld [vmem:[%s1019_s3 + $0xd8] sm:$0xff]  ;;  %v1159_v27 = vld [vmem:[%s1019_s3 + $0xd0] sm:$0xff]  ;;  %v1166_v28 = vld [vmem:[%s1019_s3 + $0xe8] sm:$0xff] }
  0x4c   : > { %v1169_v29 = vld [vmem:[%s1019_s3 + $0xe0] sm:$0xff]  ;;  %v1176_v30 = vld [vmem:[%s1019_s3 + $0xf8] sm:$0xff]  ;;  %v1179_v31 = vld [vmem:[%s1019_s3 + $0xf0] sm:$0xff] }
  0x4d   : > { %v1186_v32 = vld [vmem:[%s1019_s3 + $0x108] sm:$0xff]  ;;  %v1189_v33 = vld [vmem:[%s1019_s3 + $0x100] sm:$0xff]  ;;  %v1196_v34 = vld [vmem:[%s1019_s3 + $0x118] sm:$0xff] }
  0x4e   : > { %297 = vrot.lane.b32.xlu1 %v1056_v6, %s902_s23  ;;  %295 = vrot.lane.b32.xlu0 %v1059_v7, %s902_s23  ;;  %v1199_v35 = vld [vmem:[%s1019_s3 + $0x110] sm:$0xff]  ;;  %v1206_v36 = vld [vmem:[%s1019_s3 + $0x128] sm:$0xff] }
  0x4f   : > { %v1209_v37 = vld [vmem:[%s1019_s3 + $0x120] sm:$0xff]  ;;  %v1216_v38 = vld [vmem:[%s1019_s3 + $0x138] sm:$0xff]  ;;  %v1219_v39 = vld [vmem:[%s1019_s3 + $0x130] sm:$0xff] }
  0x50   : > { %v1226_v40 = vld [vmem:[%s1019_s3 + $0x148] sm:$0xff]  ;;  %v1229_v41 = vld [vmem:[%s1019_s3 + $0x140] sm:$0xff]  ;;  %v1236_v42 = vld [vmem:[%s1019_s3 + $0x158] sm:$0xff] }
  0x51   : > { %v1239_v43 = vld [vmem:[%s1019_s3 + $0x150] sm:$0xff]  ;;  %v1246_v44 = vld [vmem:[%s1019_s3 + $0x168] sm:$0xff]  ;;  %v1249_v45 = vld [vmem:[%s1019_s3 + $0x160] sm:$0xff] }
  0x52   : > { %301 = vrot.lane.b32.xlu1 %v1066_v8, %s902_s23  ;;  %299 = vrot.lane.b32.xlu0 %v1069_v9, %s902_s23  ;;  %v1256_v46 = vld [vmem:[%s1019_s3 + $0x178] sm:$0xff]  ;;  %v1259_v47 = vld [vmem:[%s1019_s3 + $0x170] sm:$0xff] }
  0x53   : > { %v1266_v48 = vld [vmem:[%s1019_s3 + $0x188] sm:$0xff]  ;;  %v1269_v49 = vld [vmem:[%s1019_s3 + $0x180] sm:$0xff]  ;;  %v1276_v50 = vld [vmem:[%s1019_s3 + $0x198] sm:$0xff] }
  0x54   : > { %v1279_v51 = vld [vmem:[%s1019_s3 + $0x190] sm:$0xff]  ;;  %v1286_v52 = vld [vmem:[%s1019_s3 + $0x1a8] sm:$0xff]  ;;  %v1289_v53 = vld [vmem:[%s1019_s3 + $0x1a0] sm:$0xff] }
  0x55   : > { %1615 = vst [vmem:[#allocation8_spill] sm:$0xff] %v1286_v52  ;;  %1616 = vst [vmem:[#allocation9_spill] sm:$0xff] %v1289_v53  ;;  %v1296_v54 = vld [vmem:[%s1019_s3 + $0x1b8] sm:$0xff]  ;;  %v1299_v55 = vld [vmem:[%s1019_s3 + $0x1b0] sm:$0xff] }
  0x56   : > { %305 = vrot.lane.b32.xlu1 %v1076_v10, %s902_s23  ;;  %303 = vrot.lane.b32.xlu0 %v1079_v11, %s902_s23  ;;  %1617 = vst [vmem:[#allocation10_spill] sm:$0xff] %v1296_v54  ;;  %1618 = vst [vmem:[#allocation11_spill] sm:$0xff] %v1299_v55  ;;  %v1306_v56 = vld [vmem:[%s1019_s3 + $0x1c8] sm:$0xff]  ;;  %v1309_v57 = vld [vmem:[%s1019_s3 + $0x1c0] sm:$0xff] }
  0x57   : > { %1619 = vst [vmem:[#allocation12_spill] sm:$0xff] %v1306_v56  ;;  %1620 = vst [vmem:[#allocation13_spill] sm:$0xff] %v1309_v57  ;;  %v1316_v58 = vld [vmem:[%s1019_s3 + $0x1d8] sm:$0xff]  ;;  %v1319_v59 = vld [vmem:[%s1019_s3 + $0x1d0] sm:$0xff] }
  0x58   : > { %1621 = vst [vmem:[#allocation14_spill] sm:$0xff] %v1316_v58  ;;  %1622 = vst [vmem:[#allocation15_spill] sm:$0xff] %v1319_v59  ;;  %v1326_v62 = vld [vmem:[%s1019_s3 + $0x1e8] sm:$0xff]  ;;  %v1329_v63 = vld [vmem:[%s1019_s3 + $0x1e0] sm:$0xff] }
  0x5a   : > { %309 = vrot.lane.b32.xlu1 %v1086_v12, %s902_s23  ;;  %307 = vrot.lane.b32.xlu0 %v1089_v13, %s902_s23 }
  0x5e   : > { %313 = vrot.lane.b32.xlu1 %v1096_v14, %s902_s23  ;;  %311 = vrot.lane.b32.xlu0 %v1099_v15, %s902_s23 }
  0x62   : > { %317 = vrot.lane.b32.xlu1 %v1106_v16, %s902_s23  ;;  %315 = vrot.lane.b32.xlu0 %v1109_v17, %s902_s23 }
  0x66   : > { %321 = vrot.lane.b32.xlu1 %v1116_v18, %s902_s23  ;;  %319 = vrot.lane.b32.xlu0 %v1119_v19, %s902_s23 }
  0x6a   : > { %325 = vrot.lane.b32.xlu1 %v1126_v20, %s902_s23  ;;  %323 = vrot.lane.b32.xlu0 %v1129_v21, %s902_s23 }
  0x6e   : > { %329 = vrot.lane.b32.xlu1 %v1136_v22, %s902_s23  ;;  %327 = vrot.lane.b32.xlu0 %v1139_v23, %s902_s23 }
  0x72   : > { %333 = vrot.lane.b32.xlu1 %v1146_v24, %s902_s23  ;;  %331 = vrot.lane.b32.xlu0 %v1149_v25, %s902_s23 }
  0x76   : > { %337 = vrot.lane.b32.xlu1 %v1156_v26, %s902_s23  ;;  %335 = vrot.lane.b32.xlu0 %v1159_v27, %s902_s23 }
  0x7a   : > { %341 = vrot.lane.b32.xlu1 %v1166_v28, %s902_s23  ;;  %339 = vrot.lane.b32.xlu0 %v1169_v29, %s902_s23 }
  0x7e   : > { %345 = vrot.lane.b32.xlu1 %v1176_v30, %s902_s23  ;;  %343 = vrot.lane.b32.xlu0 %v1179_v31, %s902_s23 }
  0x82   : > { %349 = vrot.lane.b32.xlu1 %v1186_v32, %s902_s23  ;;  %347 = vrot.lane.b32.xlu0 %v1189_v33, %s902_s23 }
  0x86   : > { %353 = vrot.lane.b32.xlu1 %v1196_v34, %s902_s23  ;;  %351 = vrot.lane.b32.xlu0 %v1199_v35, %s902_s23 }
  0x8a   : > { %357 = vrot.lane.b32.xlu1 %v1206_v36, %s902_s23  ;;  %355 = vrot.lane.b32.xlu0 %v1209_v37, %s902_s23 }
  0x8e   : > { %361 = vrot.lane.b32.xlu1 %v1216_v38, %s902_s23  ;;  %359 = vrot.lane.b32.xlu0 %v1219_v39, %s902_s23 }
  0x92   : > { %365 = vrot.lane.b32.xlu1 %v1226_v40, %s902_s23  ;;  %363 = vrot.lane.b32.xlu0 %v1229_v41, %s902_s23 }
  0x96   : > { %369 = vrot.lane.b32.xlu1 %v1236_v42, %s902_s23  ;;  %367 = vrot.lane.b32.xlu0 %v1239_v43, %s902_s23 }
  0x9a   : > { %373 = vrot.lane.b32.xlu1 %v1246_v44, %s902_s23  ;;  %371 = vrot.lane.b32.xlu0 %v1249_v45, %s902_s23 }
  0x9e   : > { %377 = vrot.lane.b32.xlu1 %v1256_v46, %s902_s23  ;;  %375 = vrot.lane.b32.xlu0 %v1259_v47, %s902_s23 }
  0xa2   : > { %381 = vrot.lane.b32.xlu1 %v1266_v48, %s902_s23  ;;  %379 = vrot.lane.b32.xlu0 %v1269_v49, %s902_s23 }
  0xa6   : > { %385 = vrot.lane.b32.xlu1 %v1276_v50, %s902_s23  ;;  %383 = vrot.lane.b32.xlu0 %v1279_v51, %s902_s23 }
  0xaa   : > { %389 = vrot.lane.b32.xlu1 %v1286_v52, %s902_s23  ;;  %387 = vrot.lane.b32.xlu0 %v1289_v53, %s902_s23 }
  0xae   : > { %393 = vrot.lane.b32.xlu1 %v1296_v54, %s902_s23  ;;  %391 = vrot.lane.b32.xlu0 %v1299_v55, %s902_s23 }
  0xb2   : > { %397 = vrot.lane.b32.xlu1 %v1306_v56, %s902_s23  ;;  %395 = vrot.lane.b32.xlu0 %v1309_v57, %s902_s23 }
  0xb4   : > { %v288_v60 = vpop.permute.xlu1 %287  ;;  %v284_v61 = vpop.permute.xlu0 %283 }
  0xb6   : > { %401 = vrot.lane.b32.xlu1 %v1316_v58, %s902_s23  ;;  %399 = vrot.lane.b32.xlu0 %v1319_v59, %s902_s23 }
  0xb8   : > { %v290_v57 = vpop.permute.xlu1 %289  ;;  %v286_v56 = vpop.permute.xlu0 %285 }
  0xb9   : > { %v413_v55 = vsel %vm411_vm0, %v288_v60, %v290_v57  ;;  %v511_v54 = vsub.f32 %v1036_v2, %v290_v57  ;;  %v412_v53 = vsel %vm411_vm0, %v284_v61, %v286_v56  ;;  %v509_v58 = vsub.f32 %v1039_v3, %v286_v56 }
  0xba   : > { %v510_v52 = vsub.f32 %v1026_v0, %v413_v55  ;;  %v508_v59 = vsub.f32 %v1029_v1, %v412_v53  ;;  %405 = vrot.lane.b32.xlu1 %v1326_v62, %s902_s23  ;;  %403 = vrot.lane.b32.xlu0 %v1329_v63, %s902_s23  ;;  %v1350_v0 = vld [vmem:[%s1019_s3 + $0x1f8] sm:$0xff]  ;;  %v1353_v1 = vld [vmem:[%s1019_s3 + $0x1f0] sm:$0xff] }
  0xbb   : > { %575 = vst.msk [vmem:[%s1343_s16 + $0x18] sm:$0xff] %vm411_vm0, %v511_v54  ;;  %573 = vst.msk [vmem:[%s1343_s16 + $0x8] sm:$0xff] %vm411_vm0, %v509_v58 }
  0xbc   : > { %574 = vst [vmem:[%s1343_s16 + $0x10] sm:$0xff] %v510_v52  ;;  %572 = vst [vmem:[%s1343_s16] sm:$0xff] %v508_v59  ;;  %v294_v2 = vpop.permute.xlu1 %293  ;;  %v292_v3 = vpop.permute.xlu0 %291 }
  0xbd   : > { %v513_v53 = vsub.f32 %v1046_v4, %v294_v2  ;;  %v414_v55 = vsel %vm411_vm0, %v292_v3, %v294_v2 }
  0xbe   : > { %v512_v56 = vsub.f32 %v1049_v5, %v414_v55  ;;  %409 = vrot.lane.b32.xlu1 %v1350_v0, %s902_s23  ;;  %407 = vrot.lane.b32.xlu0 %v1353_v1, %s902_s23 }
  0xbf   : > { %577 = vst.msk [vmem:[%s1343_s16 + $0x28] sm:$0xff] %vm411_vm0, %v513_v53 }
  0xc0   : > { %576 = vst [vmem:[%s1343_s16 + $0x20] sm:$0xff] %v512_v56  ;;  %v298_v52 = vpop.permute.xlu1 %297  ;;  %v296_v54 = vpop.permute.xlu0 %295 }
  0xc1   : > { %v515_v57 = vsub.f32 %v1056_v6, %v298_v52  ;;  %v415_v4 = vsel %vm411_vm0, %v296_v54, %v298_v52 }
  0xc2   : > { %v514_v5 = vsub.f32 %v1059_v7, %v415_v4 }
  0xc3   : > { %579 = vst.msk [vmem:[%s1343_s16 + $0x38] sm:$0xff] %vm411_vm0, %v515_v57 }
  0xc4   : > { %578 = vst [vmem:[%s1343_s16 + $0x30] sm:$0xff] %v514_v5  ;;  %v302_v58 = vpop.permute.xlu1 %301  ;;  %v300_v59 = vpop.permute.xlu0 %299 }
  0xc5   : > { %v517_v60 = vsub.f32 %v1066_v8, %v302_v58  ;;  %v416_v61 = vsel %vm411_vm0, %v300_v59, %v302_v58 }
  0xc6   : > { %v516_v2 = vsub.f32 %v1069_v9, %v416_v61 }
  0xc7   : > { %581 = vst.msk [vmem:[%s1343_s16 + $0x48] sm:$0xff] %vm411_vm0, %v517_v60 }
  0xc8   : > { %580 = vst [vmem:[%s1343_s16 + $0x40] sm:$0xff] %v516_v2  ;;  %v306_v6 = vpop.permute.xlu1 %305  ;;  %v304_v3 = vpop.permute.xlu0 %303 }
  0xc9   : > { %v519_v7 = vsub.f32 %v1076_v10, %v306_v6  ;;  %v417_v53 = vsel %vm411_vm0, %v304_v3, %v306_v6 }
  0xca   : > { %v518_v55 = vsub.f32 %v1079_v11, %v417_v53 }
  0xcb   : > { %583 = vst.msk [vmem:[%s1343_s16 + $0x58] sm:$0xff] %vm411_vm0, %v519_v7 }
  0xcc   : > { %582 = vst [vmem:[%s1343_s16 + $0x50] sm:$0xff] %v518_v55  ;;  %v310_v8 = vpop.permute.xlu1 %309  ;;  %v308_v56 = vpop.permute.xlu0 %307 }
  0xcd   : > { %v521_v9 = vsub.f32 %v1086_v12, %v310_v8  ;;  %v418_v52 = vsel %vm411_vm0, %v308_v56, %v310_v8 }
  0xce   : > { %v520_v54 = vsub.f32 %v1089_v13, %v418_v52 }
  0xcf   : > { %585 = vst.msk [vmem:[%s1343_s16 + $0x68] sm:$0xff] %vm411_vm0, %v521_v9 }
  0xd0   : > { %584 = vst [vmem:[%s1343_s16 + $0x60] sm:$0xff] %v520_v54  ;;  %v314_v10 = vpop.permute.xlu1 %313  ;;  %v312_v57 = vpop.permute.xlu0 %311 }
  0xd1   : > { %v523_v11 = vsub.f32 %v1096_v14, %v314_v10  ;;  %v419_v4 = vsel %vm411_vm0, %v312_v57, %v314_v10 }
  0xd2   : > { %v522_v5 = vsub.f32 %v1099_v15, %v419_v4 }
  0xd3   : > { %587 = vst.msk [vmem:[%s1343_s16 + $0x78] sm:$0xff] %vm411_vm0, %v523_v11 }
  0xd4   : > { %586 = vst [vmem:[%s1343_s16 + $0x70] sm:$0xff] %v522_v5  ;;  %v318_v12 = vpop.permute.xlu1 %317  ;;  %v316_v58 = vpop.permute.xlu0 %315 }
  0xd5   : > { %v525_v13 = vsub.f32 %v1106_v16, %v318_v12  ;;  %v420_v59 = vsel %vm411_vm0, %v316_v58, %v318_v12 }
  0xd6   : > { %v524_v60 = vsub.f32 %v1109_v17, %v420_v59 }
  0xd7   : > { %589 = vst.msk [vmem:[%s1343_s16 + $0x88] sm:$0xff] %vm411_vm0, %v525_v13 }
  0xd8   : > { %588 = vst [vmem:[%s1343_s16 + $0x80] sm:$0xff] %v524_v60  ;;  %v322_v14 = vpop.permute.xlu1 %321  ;;  %v320_v61 = vpop.permute.xlu0 %319 }
  0xd9   : > { %v527_v15 = vsub.f32 %v1116_v18, %v322_v14  ;;  %v421_v2 = vsel %vm411_vm0, %v320_v61, %v322_v14 }
  0xda   : > { %v526_v6 = vsub.f32 %v1119_v19, %v421_v2 }
  0xdb   : > { %591 = vst.msk [vmem:[%s1343_s16 + $0x98] sm:$0xff] %vm411_vm0, %v527_v15 }
  0xdc   : > { %590 = vst [vmem:[%s1343_s16 + $0x90] sm:$0xff] %v526_v6  ;;  %v326_v16 = vpop.permute.xlu1 %325  ;;  %v324_v3 = vpop.permute.xlu0 %323 }
  0xdd   : > { %v529_v17 = vsub.f32 %v1126_v20, %v326_v16  ;;  %v422_v7 = vsel %vm411_vm0, %v324_v3, %v326_v16 }
  0xde   : > { %v528_v53 = vsub.f32 %v1129_v21, %v422_v7 }
  0xdf   : > { %593 = vst.msk [vmem:[%s1343_s16 + $0xa8] sm:$0xff] %vm411_vm0, %v529_v17 }
  0xe0   : > { %592 = vst [vmem:[%s1343_s16 + $0xa0] sm:$0xff] %v528_v53  ;;  %v330_v18 = vpop.permute.xlu1 %329  ;;  %v328_v55 = vpop.permute.xlu0 %327 }
  0xe1   : > { %v531_v19 = vsub.f32 %v1136_v22, %v330_v18  ;;  %v423_v8 = vsel %vm411_vm0, %v328_v55, %v330_v18 }
  0xe2   : > { %v530_v56 = vsub.f32 %v1139_v23, %v423_v8 }
  0xe3   : > { %595 = vst.msk [vmem:[%s1343_s16 + $0xb8] sm:$0xff] %vm411_vm0, %v531_v19 }
  0xe4   : > { %594 = vst [vmem:[%s1343_s16 + $0xb0] sm:$0xff] %v530_v56  ;;  %v334_v20 = vpop.permute.xlu1 %333  ;;  %v332_v9 = vpop.permute.xlu0 %331 }
  0xe5   : > { %v533_v21 = vsub.f32 %v1146_v24, %v334_v20  ;;  %v424_v52 = vsel %vm411_vm0, %v332_v9, %v334_v20 }
  0xe6   : > { %v532_v54 = vsub.f32 %v1149_v25, %v424_v52 }
  0xe7   : > { %597 = vst.msk [vmem:[%s1343_s16 + $0xc8] sm:$0xff] %vm411_vm0, %v533_v21 }
  0xe8   : > { %596 = vst [vmem:[%s1343_s16 + $0xc0] sm:$0xff] %v532_v54  ;;  %v338_v22 = vpop.permute.xlu1 %337  ;;  %v336_v10 = vpop.permute.xlu0 %335 }
  0xe9   : > { %v535_v23 = vsub.f32 %v1156_v26, %v338_v22  ;;  %v425_v57 = vsel %vm411_vm0, %v336_v10, %v338_v22 }
  0xea   : > { %v534_v11 = vsub.f32 %v1159_v27, %v425_v57 }
  0xeb   : > { %599 = vst.msk [vmem:[%s1343_s16 + $0xd8] sm:$0xff] %vm411_vm0, %v535_v23 }
  0xec   : > { %598 = vst [vmem:[%s1343_s16 + $0xd0] sm:$0xff] %v534_v11  ;;  %v342_v24 = vpop.permute.xlu1 %341  ;;  %v340_v4 = vpop.permute.xlu0 %339 }
  0xed   : > { %v537_v25 = vsub.f32 %v1166_v28, %v342_v24  ;;  %v426_v5 = vsel %vm411_vm0, %v340_v4, %v342_v24 }
  0xee   : > { %v536_v12 = vsub.f32 %v1169_v29, %v426_v5 }
  0xef   : > { %601 = vst.msk [vmem:[%s1343_s16 + $0xe8] sm:$0xff] %vm411_vm0, %v537_v25 }
  0xf0   : > { %600 = vst [vmem:[%s1343_s16 + $0xe0] sm:$0xff] %v536_v12  ;;  %v346_v26 = vpop.permute.xlu1 %345  ;;  %v344_v58 = vpop.permute.xlu0 %343 }
  0xf1   : > { %v539_v27 = vsub.f32 %v1176_v30, %v346_v26  ;;  %v427_v13 = vsel %vm411_vm0, %v344_v58, %v346_v26 }
  0xf2   : > { %v538_v59 = vsub.f32 %v1179_v31, %v427_v13 }
  0xf3   : > { %603 = vst.msk [vmem:[%s1343_s16 + $0xf8] sm:$0xff] %vm411_vm0, %v539_v27  ;;  %v1624_v27 = vld [vmem:[#allocation9_spill] sm:$0xff] }
  0xf4   : > { %602 = vst [vmem:[%s1343_s16 + $0xf0] sm:$0xff] %v538_v59  ;;  %v350_v28 = vpop.permute.xlu1 %349  ;;  %v348_v60 = vpop.permute.xlu0 %347 }
  0xf5   : > { %v541_v29 = vsub.f32 %v1186_v32, %v350_v28  ;;  %v428_v14 = vsel %vm411_vm0, %v348_v60, %v350_v28 }
  0xf6   : > { %v540_v61 = vsub.f32 %v1189_v33, %v428_v14 }
  0xf7   : > { %605 = vst.msk [vmem:[%s1343_s16 + $0x108] sm:$0xff] %vm411_vm0, %v541_v29  ;;  %v1626_v29 = vld [vmem:[#allocation11_spill] sm:$0xff] }
  0xf8   : > { %604 = vst [vmem:[%s1343_s16 + $0x100] sm:$0xff] %v540_v61  ;;  %v354_v30 = vpop.permute.xlu1 %353  ;;  %v352_v15 = vpop.permute.xlu0 %351 }
  0xf9   : > { %v543_v31 = vsub.f32 %v1196_v34, %v354_v30  ;;  %v429_v2 = vsel %vm411_vm0, %v352_v15, %v354_v30  ;;  %v1627_v15 = vld [vmem:[#allocation12_spill] sm:$0xff] }
  0xfa   : > { %v542_v6 = vsub.f32 %v1199_v35, %v429_v2 }
  0xfb   : > { %607 = vst.msk [vmem:[%s1343_s16 + $0x118] sm:$0xff] %vm411_vm0, %v543_v31 }
  0xfc   : > { %606 = vst [vmem:[%s1343_s16 + $0x110] sm:$0xff] %v542_v6  ;;  %v358_v32 = vpop.permute.xlu1 %357  ;;  %v356_v16 = vpop.permute.xlu0 %355  ;;  %v1628_v6 = vld [vmem:[#allocation13_spill] sm:$0xff] }
  0xfd   : > { %v545_v33 = vsub.f32 %v1206_v36, %v358_v32  ;;  %v430_v3 = vsel %vm411_vm0, %v356_v16, %v358_v32 }
  0xfe   : > { %v544_v17 = vsub.f32 %v1209_v37, %v430_v3  ;;  %v1629_v3 = vld [vmem:[#allocation14_spill] sm:$0xff] }
  0xff   : > { %609 = vst.msk [vmem:[%s1343_s16 + $0x128] sm:$0xff] %vm411_vm0, %v545_v33 }
 0x100   : > { %608 = vst [vmem:[%s1343_s16 + $0x120] sm:$0xff] %v544_v17  ;;  %v362_v34 = vpop.permute.xlu1 %361  ;;  %v360_v7 = vpop.permute.xlu0 %359 }
 0x101   : > { %v547_v35 = vsub.f32 %v1216_v38, %v362_v34  ;;  %v431_v53 = vsel %vm411_vm0, %v360_v7, %v362_v34  ;;  %v1630_v7 = vld [vmem:[#allocation15_spill] sm:$0xff] }
 0x102   : > { %v546_v18 = vsub.f32 %v1219_v39, %v431_v53 }
 0x103   : > { %611 = vst.msk [vmem:[%s1343_s16 + $0x138] sm:$0xff] %vm411_vm0, %v547_v35 }
 0x104   : > { %610 = vst [vmem:[%s1343_s16 + $0x130] sm:$0xff] %v546_v18  ;;  %v366_v36 = vpop.permute.xlu1 %365  ;;  %v364_v55 = vpop.permute.xlu0 %363 }
 0x105   : > { %v549_v37 = vsub.f32 %v1226_v40, %v366_v36  ;;  %v432_v19 = vsel %vm411_vm0, %v364_v55, %v366_v36 }
 0x106   : > { %v548_v8 = vsub.f32 %v1229_v41, %v432_v19 }
 0x107   : > { %613 = vst.msk [vmem:[%s1343_s16 + $0x148] sm:$0xff] %vm411_vm0, %v549_v37 }
 0x108   : > { %612 = vst [vmem:[%s1343_s16 + $0x140] sm:$0xff] %v548_v8  ;;  %v370_v38 = vpop.permute.xlu1 %369  ;;  %v368_v56 = vpop.permute.xlu0 %367 }
 0x109   : > { %v551_v39 = vsub.f32 %v1236_v42, %v370_v38  ;;  %v433_v20 = vsel %vm411_vm0, %v368_v56, %v370_v38 }
 0x10a   : > { %v550_v9 = vsub.f32 %v1239_v43, %v433_v20 }
 0x10b   : > { %615 = vst.msk [vmem:[%s1343_s16 + $0x158] sm:$0xff] %vm411_vm0, %v551_v39 }
 0x10c   : > { %614 = vst [vmem:[%s1343_s16 + $0x150] sm:$0xff] %v550_v9  ;;  %v374_v40 = vpop.permute.xlu1 %373  ;;  %v372_v21 = vpop.permute.xlu0 %371 }
 0x10d   : > { %v553_v41 = vsub.f32 %v1246_v44, %v374_v40  ;;  %v434_v52 = vsel %vm411_vm0, %v372_v21, %v374_v40 }
 0x10e   : > { %v552_v54 = vsub.f32 %v1249_v45, %v434_v52 }
 0x10f   : > { %617 = vst.msk [vmem:[%s1343_s16 + $0x168] sm:$0xff] %vm411_vm0, %v553_v41 }
 0x110   : > { %616 = vst [vmem:[%s1343_s16 + $0x160] sm:$0xff] %v552_v54  ;;  %v378_v42 = vpop.permute.xlu1 %377  ;;  %v376_v22 = vpop.permute.xlu0 %375 }
 0x111   : > { %v555_v43 = vsub.f32 %v1256_v46, %v378_v42  ;;  %v435_v10 = vsel %vm411_vm0, %v376_v22, %v378_v42 }
 0x112   : > { %v554_v23 = vsub.f32 %v1259_v47, %v435_v10 }
 0x113   : > { %619 = vst.msk [vmem:[%s1343_s16 + $0x178] sm:$0xff] %vm411_vm0, %v555_v43 }
 0x114   : > { %618 = vst [vmem:[%s1343_s16 + $0x170] sm:$0xff] %v554_v23  ;;  %v382_v44 = vpop.permute.xlu1 %381  ;;  %v380_v57 = vpop.permute.xlu0 %379 }
 0x115   : > { %v557_v45 = vsub.f32 %v1266_v48, %v382_v44  ;;  %v436_v11 = vsel %vm411_vm0, %v380_v57, %v382_v44 }
 0x116   : > { %v556_v24 = vsub.f32 %v1269_v49, %v436_v11  ;;  %v1623_v49 = vld [vmem:[#allocation8_spill] sm:$0xff] }
 0x117   : > { %621 = vst.msk [vmem:[%s1343_s16 + $0x188] sm:$0xff] %vm411_vm0, %v557_v45 }
 0x118   : > { %620 = vst [vmem:[%s1343_s16 + $0x180] sm:$0xff] %v556_v24  ;;  %v386_v46 = vpop.permute.xlu1 %385  ;;  %v384_v4 = vpop.permute.xlu0 %383 }
 0x119   : > { %v559_v47 = vsub.f32 %v1276_v50, %v386_v46  ;;  %v437_v25 = vsel %vm411_vm0, %v384_v4, %v386_v46 }
 0x11a   : > { %v558_v5 = vsub.f32 %v1279_v51, %v437_v25  ;;  %v1625_v51 = vld [vmem:[#allocation10_spill] sm:$0xff] }
 0x11b   : > { %623 = vst.msk [vmem:[%s1343_s16 + $0x198] sm:$0xff] %vm411_vm0, %v559_v47 }
 0x11c   : > { %622 = vst [vmem:[%s1343_s16 + $0x190] sm:$0xff] %v558_v5  ;;  %v390_v48 = vpop.permute.xlu1 %389  ;;  %v388_v12 = vpop.permute.xlu0 %387 }
 0x11d   : > { %v561_v26 = vsub.f32 %v1623_v49, %v390_v48  ;;  %v438_v58 = vsel %vm411_vm0, %v388_v12, %v390_v48 }
 0x11e   : > { %v560_v13 = vsub.f32 %v1624_v27, %v438_v58 }
 0x11f   : > { %625 = vst.msk [vmem:[%s1343_s16 + $0x1a8] sm:$0xff] %vm411_vm0, %v561_v26 }
 0x120   : > { %624 = vst [vmem:[%s1343_s16 + $0x1a0] sm:$0xff] %v560_v13  ;;  %v394_v50 = vpop.permute.xlu1 %393  ;;  %v392_v59 = vpop.permute.xlu0 %391 }
 0x121   : > { %v563_v28 = vsub.f32 %v1625_v51, %v394_v50  ;;  %v439_v60 = vsel %vm411_vm0, %v392_v59, %v394_v50 }
 0x122   : > { %v562_v14 = vsub.f32 %v1626_v29, %v439_v60 }
 0x123   : > { %627 = vst.msk [vmem:[%s1343_s16 + $0x1b8] sm:$0xff] %vm411_vm0, %v563_v28 }
 0x124   : > { %626 = vst [vmem:[%s1343_s16 + $0x1b0] sm:$0xff] %v562_v14  ;;  %v398_v61 = vpop.permute.xlu1 %397  ;;  %v396_v30 = vpop.permute.xlu0 %395 }
 0x125   : > { %v565_v31 = vsub.f32 %v1627_v15, %v398_v61  ;;  %v440_v2 = vsel %vm411_vm0, %v396_v30, %v398_v61 }
 0x126   : > { %v564_v32 = vsub.f32 %v1628_v6, %v440_v2 }
 0x127   : > { %629 = vst.msk [vmem:[%s1343_s16 + $0x1c8] sm:$0xff] %vm411_vm0, %v565_v31 }
 0x128   : > { %628 = vst [vmem:[%s1343_s16 + $0x1c0] sm:$0xff] %v564_v32  ;;  %v402_v16 = vpop.permute.xlu1 %401  ;;  %v400_v33 = vpop.permute.xlu0 %399 }
 0x129   : > { %v567_v17 = vsub.f32 %v1629_v3, %v402_v16  ;;  %v441_v34 = vsel %vm411_vm0, %v400_v33, %v402_v16 }
 0x12a   : > { %v566_v35 = vsub.f32 %v1630_v7, %v441_v34 }
 0x12b   : > { %631 = vst.msk [vmem:[%s1343_s16 + $0x1d8] sm:$0xff] %vm411_vm0, %v567_v17 }
 0x12c   : > { %630 = vst [vmem:[%s1343_s16 + $0x1d0] sm:$0xff] %v566_v35  ;;  %v406_v53 = vpop.permute.xlu1 %405  ;;  %v404_v18 = vpop.permute.xlu0 %403 }
 0x12d   : > { %v569_v36 = vsub.f32 %v1326_v62, %v406_v53  ;;  %v442_v55 = vsel %vm411_vm0, %v404_v18, %v406_v53 }
 0x12e   : > { %v568_v37 = vsub.f32 %v1329_v63, %v442_v55 }
 0x12f   : > { %633 = vst.msk [vmem:[%s1343_s16 + $0x1e8] sm:$0xff] %vm411_vm0, %v569_v36 }
 0x130   : > { %632 = vst [vmem:[%s1343_s16 + $0x1e0] sm:$0xff] %v568_v37  ;;  %v410_v19 = vpop.permute.xlu1 %409  ;;  %v408_v8 = vpop.permute.xlu0 %407  ;;  %643 = sbr.rel (!%p960_p9) target bundleno = 336 (0x150), region = 32 }
 0x131   : > { %v571_v38 = vsub.f32 %v1350_v0, %v410_v19  ;;  %v443_v56 = vsel %vm411_vm0, %v408_v8, %v410_v19 }
 0x132   : > { %v570_v39 = vsub.f32 %v1353_v1, %v443_v56 }
 0x133   : > { %635 = vst.msk [vmem:[%s1343_s16 + $0x1f8] sm:$0xff] %vm411_vm0, %v571_v38 }
 0x134   : > { %634 = vst [vmem:[%s1343_s16 + $0x1f0] sm:$0xff] %v570_v39 }
 0x135   : > { %s1639_s2 = smov (!%p646_p6, %s645_s2), 32 }
 0x136   : > { %s1545_s4 = sshll.u32 %s1639_s2, 8 }
 0x137   : > { %s651_s5 = ssub.s32 8192, %s1545_s4 }
 0x138   : > { %652 = vsyncadd %s637_s25, %s651_s5  ;;  %p750_p10 = scmp.ne.s32.totalorder %s1545_s4, 0  ;;  %s762_s17 = sshll.u32 %s937_s10, 13 }
 0x139   : > { %s1555_s14 = scalar_lea.hbm %s1603_s1, %s762_s17  ;;  %s658_s19 = sshll.u32 %s1343_s16, 4  ;;  %s1558_s19 = int_to_ptr.vmem [resolvable:$true] %s658_s19 }
 0x13a   : > { %s833_s20 = scalar_lea.vmem %s1558_s19, %s1545_s4  ;;  %s903_s21 = smov [#allocation5]  }
 0x13b   : > { %p834_p9 = scmp.ne.s32.totalorder %s1558_s19, %s833_s20  ;;  %s837_s22 = sshll.u32 %s903_s21, 4  ;;  %s838_s22 = int_to_ptr.vmem [resolvable:$false] %s837_s22 }
 0x13c   : > { %s839_s10 = scalar_lea.vmem %s838_s22, 16384  ;;  %p840_p8 = scmp.lt.s32.totalorder %s1558_s19, %s838_s22 }
 0x13d   : > { %p835_p13 = pnand %p834_p9, %p750_p10  ;;  %p841_p11 = scmp.lt.s32.totalorder %s839_s10, %s833_s20 }
 0x13f   : > { %p836_p7 = pneg %p835_p13  ;;  %p842_p12 = por %p841_p11, %p840_p8 }
 0x141   : > { %p843_p0 = pnand %p842_p12, %p836_p7 }
 0x143   : > { %846 = shalt.err (!%p843_p0)
}
 0x144   : > { %s847_s24 = scalar_lea.hbm %s1555_s14, %s1545_s4  ;;  %s851_s29 = scalar_lea.hbm %s1603_s1, 64000 }
 0x145   : > { %p848_p1 = scmp.ne.s32.totalorder %s1555_s14, %s847_s24  ;;  %p852_p4 = scmp.lt.s32.totalorder %s1555_s14, %s1603_s1 }
 0x146   : > { %p853_p5 = scmp.lt.s32.totalorder %s851_s29, %s847_s24 }
 0x147   : > { %p849_p3 = pnand %p848_p1, %p750_p10 }
 0x148   : > { %p854_p6 = por %p853_p5, %p852_p4 }
 0x149   : > { %p850_p2 = pneg %p849_p3 }
 0x14b   : > { %p855_p9 = pnand %p854_p6, %p850_p2 }
 0x14d   : > { %858 = shalt.err (!%p855_p9)
}
 0x14e   : > { %s904_s16 = smov 256   ;;  %s905_s30 = smov 16  }
 0x14f   : > { %664 = dma.vmem_to_hbm [thread:$0]  (%p750_p10), %s1558_s19, %s1545_s4, %s1555_s14, %s637_s25, %s904_s16, %s904_s16, %s905_s30  }
 0x150 PF: > { %p769_p13 = scmp.ge.s32.totalorder %s897_s9, 2  ;;  %s673_s2 = sand.u32 1, %s885_s6  }
 0x151   : > { %p1631_p7 = scmp.ne.s32.totalorder %s1614_s18, 0  ;;  %s674_s5 = scalar_lea.sflag [#allocation4], %s673_s2 }
 0x153   : > { %p766_p8 = pnand %p769_p13, %p1631_p7 }
 0x155   : > { %p767_p11 = pneg %p766_p8 }
 0x157   : > { %880 = dma.done.wait (%p767_p11), %s674_s5, 8192  }
 0x158   : > { %882 = vsyncadd (%p767_p11), %s674_s5, 4294959104  ;;  %p14_p12 = scmp.ge.s32.totalorder %s941_s12, 10   ;;  %s1632_s6 = smov %s889_s7 }
 0x159   : > { %s1633_s7 = smov %s893_s8  ;;  %s1634_s8 = smov %s953_s15 }
 0x15a   : > { %s1635_s9 = smov %s941_s12  ;;  %16 = sbr.rel (!%p14_p12) target bundleno = 5 (0x5), region = 69 }
 0x15f   :  { %679 = vsyncpa [#allocation3], 1 }
 0x160   :  { %681 = vsyncpa [#allocation3 + $0x1], 1 }
 0x161   :  { %682 = vsyncpa [#allocation4], 1 }
 0x162   :  { %684 = vsyncpa [#allocation4 + $0x1], 1 }

</bundles_post_ra>
